<compile_context>
chip_gen: v7x
topology: tpu7x:2x2x1
jax: 0.10.0
libtpu: 0.0.40
codegen_flags: <defaults>
</compile_context>

<pallas_src>
import math

import jax
import jax.numpy as jnp
from jax.experimental import pallas as pl
from jax.experimental.pallas import tpu as pltpu


def _round_up(x, m):
    return (x + m - 1) // m * m


# -----------------------------------------------------------------------------
# Stage 1: support = features @ weight  (computed once; emitted in bf16)
# -----------------------------------------------------------------------------
def _support_kernel(feat_ref, w_ref, sup_ref):
    sup = jnp.dot(feat_ref[...], w_ref[...], preferred_element_type=jnp.float32)
    sup_ref[...] = sup.astype(sup_ref.dtype)


# -----------------------------------------------------------------------------
# Stage 2: out = relu(adj @ support), K-tiled with an f32 VMEM accumulator
# -----------------------------------------------------------------------------
def _make_agg_kernel(active: bool, resident_support: bool, tile_k: int):
    def agg_kernel(adj_ref, sup_ref, out_ref, acc_ref):
        k = pl.program_id(1)

        @pl.when(k == 0)
        def _():
            acc_ref[...] = jnp.zeros_like(acc_ref)

        # Cast the adj tile to bf16 in-kernel (no-op if it already is): keeps
        # the MXU on the single-pass bf16 path without an extra wrapper-side
        # pad/cast pass over adj in HBM.
        a = adj_ref[...].astype(jnp.bfloat16)
        if resident_support:
            start = pl.multiple_of(k * tile_k, tile_k)
            s = sup_ref[pl.ds(start, tile_k), :]
        else:
            s = sup_ref[...]
        acc_ref[...] += jnp.dot(a, s, preferred_element_type=jnp.float32)

        @pl.when(k == pl.num_programs(1) - 1)
        def _():
            out = acc_ref[...]
            if active:
                out = jnp.maximum(out, 0.0)
            out_ref[...] = out.astype(out_ref.dtype)

    return agg_kernel


def gnn_layer(features, adj, weight, *, active=True, tile_m=512, tile_k=1024):
    """Pallas implementation of GNNLayer.forward (adj treated as dense)."""
    n, f_in = features.shape
    f_in_w, f_out = weight.shape
    assert f_in == f_in_w, "weight in_features mismatch"
    assert adj.shape == (n, n), "adj must be [N, N]"
    assert tile_m % 8 == 0, "tile_m must be a multiple of 8"
    assert tile_k % 128 == 0, "tile_k must be a multiple of 128"

    f_out_pad = _round_up(f_out, 128)          # lane-dense support/output width

    # ---- Tile selection: independent per axis, megacore-friendly M axis ----
    tile_m = min(tile_m, _round_up(n, 8))
    if tile_m >= n and n > 8:
        # Split so the "parallel" M axis has >= 2 grid steps (v7x: 2 TCs/chip).
        tile_m = _round_up((n + 1) // 2, 8)
    tile_k = min(tile_k, _round_up(n, 128))
    n_pad_m = _round_up(n, tile_m)             # adj rows / output rows
    n_pad_k = _round_up(n, tile_k)             # adj cols / support rows

    # ---- adj: avoid a redundant pad/cast pass when no padding is needed ----
    if n_pad_m == n and n_pad_k == n:
        adj_in = adj                           # stream original dtype, cast in-kernel
    else:
        # Padding is required anyway -> do pad + bf16 cast in one XLA op.
        adj_in = jnp.zeros((n_pad_m, n_pad_k), jnp.bfloat16).at[:n, :n].set(
            adj.astype(jnp.bfloat16))
    adj_item = jnp.dtype(adj_in.dtype).itemsize

    feat_in = features if n_pad_k == n else (
        jnp.zeros((n_pad_k, f_in), features.dtype).at[:n, :].set(features))
    w_in = weight if f_out_pad == f_out else (
        jnp.zeros((f_in, f_out_pad), weight.dtype).at[:, :f_out].set(weight))

    # ---- Stage 1: support = features @ weight (once, tiny vs stage 2) ----
    support = pl.pallas_call(
        _support_kernel,
        out_shape=jax.ShapeDtypeStruct((n_pad_k, f_out_pad), jnp.bfloat16),
        grid_spec=pltpu.PrefetchScalarGridSpec(
            num_scalar_prefetch=0,
            grid=(n_pad_k // tile_k,),
            in_specs=[
                pl.BlockSpec((tile_k, f_in), lambda i: (i, 0)),
                pl.BlockSpec((f_in, f_out_pad), lambda i: (0, 0)),  # resident
            ],
            out_specs=pl.BlockSpec((tile_k, f_out_pad), lambda i: (i, 0)),
        ),
        compiler_params=pltpu.CompilerParams(
            dimension_semantics=("parallel",),
        ),
        cost_estimate=pl.CostEstimate(
            flops=2 * n_pad_k * f_in * f_out_pad,
            transcendentals=0,
            bytes_accessed=(feat_in.size * jnp.dtype(feat_in.dtype).itemsize
                            + w_in.size * jnp.dtype(w_in.dtype).itemsize
                            + n_pad_k * f_out_pad * 2),
        ),
    )(feat_in, w_in)

    # ---- Stage 2: out = relu(adj @ support) ----
    sup_bytes = n_pad_k * f_out_pad * 2
    resident = sup_bytes <= (8 << 20)          # whole support resident in VMEM
    if resident:
        sup_spec = pl.BlockSpec((n_pad_k, f_out_pad), lambda i, k: (0, 0))
        sup_vmem = 2 * sup_bytes               # conservative buffering estimate
        sup_hbm = sup_bytes                    # fetched once
    else:
        sup_spec = pl.BlockSpec((tile_k, f_out_pad), lambda i, k: (k, 0))
        sup_vmem = 2 * tile_k * f_out_pad * 2
        sup_hbm = sup_bytes * (n_pad_m // tile_m)   # refetched per row tile

    # Real per-call VMEM sum; cap below v7x's 64 MiB/TC physical ceiling.
    vmem_needed = (2 * tile_m * tile_k * adj_item      # adj tiles, double-buffered
                   + sup_vmem                          # support
                   + 2 * tile_m * f_out_pad * 4        # output tiles (f32)
                   + tile_m * f_out_pad * 4)           # f32 accumulator scratch
    vmem_limit = int(min(48 << 20, max(16 << 20, vmem_needed + (2 << 20))))

    out_p = pl.pallas_call(
        _make_agg_kernel(active, resident, tile_k),
        out_shape=jax.ShapeDtypeStruct((n_pad_m, f_out_pad), jnp.float32),
        grid_spec=pltpu.PrefetchScalarGridSpec(
            num_scalar_prefetch=0,
            grid=(n_pad_m // tile_m, n_pad_k // tile_k),
            in_specs=[
                pl.BlockSpec((tile_m, tile_k), lambda i, k: (i, k)),
                sup_spec,
            ],
            out_specs=pl.BlockSpec((tile_m, f_out_pad), lambda i, k: (i, 0)),
            scratch_shapes=[pltpu.VMEM((tile_m, f_out_pad), jnp.float32)],
        ),
        compiler_params=pltpu.CompilerParams(
            dimension_semantics=("parallel", "arbitrary"),
            vmem_limit_bytes=vmem_limit,
        ),
        cost_estimate=pl.CostEstimate(
            flops=2 * n_pad_m * n_pad_k * f_out_pad,
            transcendentals=0,
            bytes_accessed=(n_pad_m * n_pad_k * adj_item   # adj stream (actual dtype)
                            + sup_hbm                      # support (resident or refetched)
                            + n_pad_m * f_out_pad * 4),    # f32 output writeback
        ),
    )(adj_in, support)

    if n_pad_m == n and f_out_pad == f_out:
        return out_p
    return out_p[:n, :f_out]


def xavier_uniform(key, fan_in, fan_out, dtype=jnp.float32):
    # Matches torch.nn.init.xavier_uniform_ (gain=1).
    bound = math.sqrt(6.0 / (fan_in + fan_out))
    return jax.random.uniform(
        key, (fan_in, fan_out), dtype=dtype, minval=-bound, maxval=bound
    )


if __name__ == "__main__":
    key = jax.random.PRNGKey(0)
    k_feat, k_adj, k_w = jax.random.split(key, 3)

    N = 256        # number of graph nodes
    F_IN = 64      # in_features
    F_OUT = 64     # out_features

    features = jax.random.normal(k_feat, (N, F_IN), dtype=jnp.float32)

    # Dense (row-normalized) adjacency standing in for the sparse adj of spmm.
    # TODO(synk): true torch.spmm sparse formats have no direct Pallas
    # equivalent here; adjacency is handled as a dense [N, N] matrix.
    adj_raw = (jax.random.uniform(k_adj, (N, N)) < 0.1).astype(jnp.float32)
    adj_raw = adj_raw + jnp.eye(N, dtype=jnp.float32)  # self loops
    adj = adj_raw / jnp.sum(adj_raw, axis=1, keepdims=True)

    weight = xavier_uniform(k_w, F_IN, F_OUT)

    out = gnn_layer(features, adj, weight, active=True)
    out = jax.block_until_ready(out)

    # Reference check in plain f32 JAX (kernel streams adj/support to the MXU
    # in bf16, accumulates in f32 -> allow bf16-level tolerance).
    ref = jnp.maximum(adj @ (features @ weight), 0.0)
    assert out.shape == (N, F_OUT)
    assert jnp.allclose(out, ref, atol=1e-2, rtol=1e-2), "mismatch vs reference"

    print("KERNEL_OK")
</pallas_src>

<mosaic_0001>
module attributes {stable_mosaic.version = 11 : i64} {
  func.func @_support_kernel(%arg0: i32, %arg1: memref<256x64xf32, #tpu.memory_space<vmem>>, %arg2: memref<64x128xf32, #tpu.memory_space<vmem>>, %arg3: memref<256x128xbf16, #tpu.memory_space<vmem>>) attributes {dimension_semantics = [#tpu.dimension_semantics<parallel>], iteration_bounds = array<i64: 1>, scalar_prefetch = 0 : i64, scratch_operands = 0 : i64, tpu.core_type = #tpu.core_type<tc>, window_params = [{transform_indices = @transform_0, window_bounds = array<i64: 256, 64>}, {pipeline_mode = #tpu.pipeline_mode<synchronous>, transform_indices = @transform_1, window_bounds = array<i64: 64, 128>}, {transform_indices = @transform_2, window_bounds = array<i64: 256, 128>}]} {
    %c0 = arith.constant 0 : index
    %c0_0 = arith.constant 0 : index
    %0 = vector.load %arg1[%c0, %c0_0] : memref<256x64xf32, #tpu.memory_space<vmem>>, vector<256x64xf32>
    %c0_1 = arith.constant 0 : index
    %c0_2 = arith.constant 0 : index
    %1 = vector.load %arg2[%c0_1, %c0_2] : memref<64x128xf32, #tpu.memory_space<vmem>>, vector<64x128xf32>
    %cst = arith.constant dense<0.000000e+00> : vector<256x128xf32>
    %2 = tpu.matmul %0, %1, %cst {dimension_numbers = #tpu.dot_dimension_numbers<[1], [0], [0], [1], [0, 0, 1, 1], [], []>} : vector<256x64xf32>, vector<64x128xf32>, vector<256x128xf32> -> vector<256x128xf32>
    %3 = arith.truncf %2 : vector<256x128xf32> to vector<256x128xbf16>
    %c0_3 = arith.constant 0 : index
    %c0_4 = arith.constant 0 : index
    %4 = vector.load %arg3[%c0_3, %c0_4] : memref<256x128xbf16, #tpu.memory_space<vmem>>, vector<256x128xbf16>
    tpu.vector_store %arg3[%c0_3, %c0_4], %3 {strides = array<i32>} : memref<256x128xbf16, #tpu.memory_space<vmem>>, vector<256x128xbf16>,
    return
  }
  func.func @transform_0(%arg0: i32) -> (i32, i32) {
    %c0_i32 = arith.constant 0 : i32
    %c0_i32_0 = arith.constant 0 : i32
    return %arg0, %c0_i32 : i32, i32
  }
  func.func @transform_1(%arg0: i32) -> (i32, i32) {
    %c0_i32 = arith.constant 0 : i32
    %c0_i32_0 = arith.constant 0 : i32
    %c0_i32_1 = arith.constant 0 : i32
    return %c0_i32, %c0_i32_0 : i32, i32
  }
  func.func @transform_2(%arg0: i32) -> (i32, i32) {
    %c0_i32 = arith.constant 0 : i32
    %c0_i32_0 = arith.constant 0 : i32
    return %arg0, %c0_i32 : i32, i32
  }
}

</mosaic_0001>

<bundles_post_ra>
// kernel: tpu_custom_call.1
= control target key start
LH: loop header
LB: loop body
LE: loop exit
PB: predicated region body
PF: predicated region fallthrough
CT: control target
= control target key end

     0   :  { %vm52_vm0 = vcmask 523264   ;;  %s1078_s0 = inlined_call_operand.vmem [shape: f32[256,64], index: 0, kind: input, shape index: {}]   ;;  %s1079_s1 = inlined_call_operand.vmem [shape: f32[64,128], index: 1, kind: input, shape index: {}]   ;;  %s1080_s2 = inlined_call_operand.hbm [shape: bf16[256,128], index: 2, kind: output, shape index: {}]  }
   0x1   :  { %v44_v0 = vld [vmem:[%s1079_s1] sm:$0xff]  ;;  %v45_v1 = vld [vmem:[%s1079_s1 + $0x8] sm:$0xff]  ;;  %v46_v2 = vld [vmem:[%s1079_s1 + $0x10] sm:$0xff] }
   0x2   :  { %v845_v3 = vpack.c.bf16 %v45_v1, %v44_v0  ;;  %v47_v4 = vld [vmem:[%s1079_s1 + $0x18] sm:$0xff]  ;;  %v48_v6 = vld [vmem:[%s1079_s1 + $0x20] sm:$0xff]  ;;  %v49_v7 = vld [vmem:[%s1079_s1 + $0x28] sm:$0xff] }
   0x3   :  { %v849_v5 = vpack.c.bf16 %v47_v4, %v46_v2  ;;  %v12_v8 = vld [vmem:[%s1078_s0] sm:$0xff]  ;;  %v853_v10 = vpack.c.bf16 %v49_v7, %v48_v6  ;;  %v50_v11 = vld [vmem:[%s1079_s1 + $0x30] sm:$0xff]  ;;  %v51_v12 = vld [vmem:[%s1079_s1 + $0x38] sm:$0xff] }
   0x4   :  { %846 = vmatprep.subr.bf16.mxu0 %v845_v3  ;;  %861 = vmatprep.subr.bf16.mxu1 %v845_v3  ;;  %v28_v9 = vld [vmem:[%s1078_s0 + $0x80] sm:$0xff]  ;;  %v857_v13 = vpack.c.bf16 %v51_v12, %v50_v11 }
   0x5   :  { %848 = vmatpush3.bf16.msra.mxu0 %v845_v3  ;;  %865 = vmatpush3.bf16.msra.mxu1 %v845_v3 }
   0x6   :  { %850 = vmatprep.subr.bf16.mxu0 %v849_v5  ;;  %862 = vmatprep.subr.bf16.mxu1 %v849_v5 }
   0x7   :  { %797 = vmatprep.mubr.msk.f32.mxu0 %vm52_vm0, %v12_v8  ;;  %821 = vmatprep.mubr.msk.f32.mxu1 %vm52_vm0, %v28_v9 }
   0x9   :  { %852 = vmatpush3.bf16.msra.mxu0 %v849_v5  ;;  %866 = vmatpush3.bf16.msra.mxu1 %v849_v5 }
   0xa   :  { %854 = vmatprep.subr.bf16.mxu0 %v853_v10  ;;  %863 = vmatprep.subr.bf16.mxu1 %v853_v10 }
   0xd   :  { %856 = vmatpush3.bf16.msra.mxu0 %v853_v10  ;;  %867 = vmatpush3.bf16.msra.mxu1 %v853_v10 }
   0xe   :  { %858 = vmatprep.subr.bf16.mxu0 %v857_v13  ;;  %864 = vmatprep.subr.bf16.mxu1 %v857_v13 }
   0xf   :  { %7 = vsyncpa [#allocation3], 0  ;;  %v13_v14 = vld [vmem:[%s1078_s0 + $0x8] sm:$0xff]  ;;  %v14_v16 = vld [vmem:[%s1078_s0 + $0x10] sm:$0xff] }
  0x10   :  { %v29_v15 = vld [vmem:[%s1078_s0 + $0x88] sm:$0xff]  ;;  %v30_v17 = vld [vmem:[%s1078_s0 + $0x90] sm:$0xff]  ;;  %v15_v18 = vld [vmem:[%s1078_s0 + $0x18] sm:$0xff] }
  0x11   :  { %860 = vmatpush3.bf16.msra.mxu0 %v857_v13  ;;  %868 = vmatpush3.bf16.msra.mxu1 %v857_v13  ;;  %v31_v19 = vld [vmem:[%s1078_s0 + $0x98] sm:$0xff]  ;;  %v16_v20 = vld [vmem:[%s1078_s0 + $0x20] sm:$0xff]  ;;  %v17_v22 = vld [vmem:[%s1078_s0 + $0x28] sm:$0xff] }
  0x12   :  { %v32_v21 = vld [vmem:[%s1078_s0 + $0xa0] sm:$0xff]  ;;  %v33_v23 = vld [vmem:[%s1078_s0 + $0xa8] sm:$0xff]  ;;  %v18_v24 = vld [vmem:[%s1078_s0 + $0x30] sm:$0xff] }
  0x13   :  { %v34_v25 = vld [vmem:[%s1078_s0 + $0xb0] sm:$0xff]  ;;  %v19_v26 = vld [vmem:[%s1078_s0 + $0x38] sm:$0xff]  ;;  %v20_v28 = vld [vmem:[%s1078_s0 + $0x40] sm:$0xff] }
  0x14   :  { %798 = vmatmul.mubr.msk.f32.vlgmr.msra.gmra.mrb[0].mxu0 %vm52_vm0, %v13_v14  ;;  %822 = vmatmul.mubr.msk.f32.vlgmr.msra.gmra.mrb[0].mxu1 %vm52_vm0, %v29_v15  ;;  %v35_v27 = vld [vmem:[%s1078_s0 + $0xb8] sm:$0xff]  ;;  %v36_v29 = vld [vmem:[%s1078_s0 + $0xc0] sm:$0xff]  ;;  %v21_v30 = vld [vmem:[%s1078_s0 + $0x48] sm:$0xff] }
  0x15   :  { %800 = vmatprep.mubr.msk.f32.mxu0 %vm52_vm0, %v14_v16  ;;  %824 = vmatprep.mubr.msk.f32.mxu1 %vm52_vm0, %v30_v17  ;;  %v37_v31 = vld [vmem:[%s1078_s0 + $0xc8] sm:$0xff]  ;;  %v22_v32 = vld [vmem:[%s1078_s0 + $0x50] sm:$0xff]  ;;  %v23_v34 = vld [vmem:[%s1078_s0 + $0x58] sm:$0xff] }
  0x16   :  { %v38_v33 = vld [vmem:[%s1078_s0 + $0xd0] sm:$0xff]  ;;  %v39_v35 = vld [vmem:[%s1078_s0 + $0xd8] sm:$0xff]  ;;  %v24_v36 = vld [vmem:[%s1078_s0 + $0x60] sm:$0xff] }
  0x17   :  { %v40_v37 = vld [vmem:[%s1078_s0 + $0xe0] sm:$0xff]  ;;  %v25_v38 = vld [vmem:[%s1078_s0 + $0x68] sm:$0xff]  ;;  %v26_v40 = vld [vmem:[%s1078_s0 + $0x70] sm:$0xff] }
  0x18   :  { %801 = vmatmul.mubr.msk.f32.gmra.mrb[2].mxu0 %vm52_vm0, %v15_v18  ;;  %825 = vmatmul.mubr.msk.f32.gmra.mrb[2].mxu1 %vm52_vm0, %v31_v19  ;;  %v41_v39 = vld [vmem:[%s1078_s0 + $0xe8] sm:$0xff]  ;;  %v42_v41 = vld [vmem:[%s1078_s0 + $0xf0] sm:$0xff]  ;;  %v27_v42 = vld [vmem:[%s1078_s0 + $0x78] sm:$0xff] }
  0x19   :  { %803 = vmatprep.mubr.msk.f32.mxu0 %vm52_vm0, %v16_v20  ;;  %827 = vmatprep.mubr.msk.f32.mxu1 %vm52_vm0, %v32_v21  ;;  %v43_v43 = vld [vmem:[%s1078_s0 + $0xf8] sm:$0xff]  ;;  %s896_s0 = smov [#allocation2]  }
  0x1a   :  { %s539_s1 = sshll.u32 %s896_s0, 4  ;;  %s540_s1 = int_to_ptr.vmem [resolvable:$true] %s539_s1 }
  0x1b   :  { %s872_s3 = scalar_lea.vmem %s540_s1, 2048  ;;  %p877_p1 = scmp.lt.s32.totalorder %s540_s1, %s540_s1 }
  0x1c   :  { %804 = vmatmul.mubr.msk.f32.gmra.mrb[4].mxu0 %vm52_vm0, %v17_v22  ;;  %828 = vmatmul.mubr.msk.f32.gmra.mrb[4].mxu1 %vm52_vm0, %v33_v23  ;;  %p873_p0 = scmp.ne.s32.totalorder %s540_s1, %s872_s3  ;;  %p878_p2 = scmp.lt.s32.totalorder %s872_s3, %s872_s3 }
  0x1d   :  { %806 = vmatprep.mubr.msk.f32.mxu0 %vm52_vm0, %v18_v24  ;;  %830 = vmatprep.mubr.msk.f32.mxu1 %vm52_vm0, %v34_v25 }
  0x1e   :  { %p879_p3 = por %p878_p2, %p877_p1 }
  0x20   :  { %807 = vmatmul.mubr.msk.f32.gmra.mrb[6].mxu0 %vm52_vm0, %v19_v26  ;;  %831 = vmatmul.mubr.msk.f32.gmra.mrb[6].mxu1 %vm52_vm0, %v35_v27  ;;  %p880_p4 = pnand %p879_p3, %p873_p0 }
  0x21   :  { %809 = vmatprep.mubr.msk.f32.mxu0 %vm52_vm0, %v20_v28  ;;  %833 = vmatprep.mubr.msk.f32.mxu1 %vm52_vm0, %v36_v29 }
  0x24   :  { %810 = vmatmul.mubr.msk.f32.gmra.mrb[8].mxu0 %vm52_vm0, %v21_v30  ;;  %834 = vmatmul.mubr.msk.f32.gmra.mrb[8].mxu1 %vm52_vm0, %v37_v31 }
  0x25   :  { %812 = vmatprep.mubr.msk.f32.mxu0 %vm52_vm0, %v22_v32  ;;  %836 = vmatprep.mubr.msk.f32.mxu1 %vm52_vm0, %v38_v33 }
  0x28   :  { %813 = vmatmul.mubr.msk.f32.gmra.mrb[10].mxu0 %vm52_vm0, %v23_v34  ;;  %837 = vmatmul.mubr.msk.f32.gmra.mrb[10].mxu1 %vm52_vm0, %v39_v35 }
  0x29   :  { %815 = vmatprep.mubr.msk.f32.mxu0 %vm52_vm0, %v24_v36  ;;  %839 = vmatprep.mubr.msk.f32.mxu1 %vm52_vm0, %v40_v37 }
  0x2c   :  { %816 = vmatmul.mubr.msk.f32.gmra.mrb[12].mxu0 %vm52_vm0, %v25_v38  ;;  %840 = vmatmul.mubr.msk.f32.gmra.mrb[12].mxu1 %vm52_vm0, %v41_v39 }
  0x2d   :  { %818 = vmatprep.mubr.msk.f32.mxu0 %vm52_vm0, %v26_v40  ;;  %842 = vmatprep.mubr.msk.f32.mxu1 %vm52_vm0, %v42_v41 }
  0x30   :  { %819 = vmatmul.mubr.msk.f32.gmra.mrb[14].mxu0 %vm52_vm0, %v27_v42  ;;  %843 = vmatmul.mubr.msk.f32.gmra.mrb[14].mxu1 %vm52_vm0, %v43_v43 }
  0xe7   :  { %v799_v44 = vpop.f32.mrb[0].mxu0  ;;  %v823_v45 = vpop.f32.mrb[0].mxu1 }
  0xe8   :  { %v215_v46 = vpop.f32.mrb[1].mxu0  ;;  %v295_v47 = vpop.f32.mrb[1].mxu1 }
  0xe9   :  { %v649_v48 = vpack.c.bf16 %v799_v44, %v215_v46  ;;  %v689_v49 = vpack.c.bf16 %v823_v45, %v295_v47 }
  0xeb   :  { %650 = vst [vmem:[#allocation2] sm:$0xff] %v649_v48   ;;  %733 = vst [vmem:[#allocation2 + $0x40] sm:$0xff] %v689_v49   ;;  %v802_v50 = vpop.f32.mrb[2].mxu0  ;;  %v826_v51 = vpop.f32.mrb[2].mxu1 }
  0xec   :  { %v225_v52 = vpop.f32.mrb[3].mxu0  ;;  %v305_v53 = vpop.f32.mrb[3].mxu1 }
  0xed   :  { %v654_v54 = vpack.c.bf16 %v802_v50, %v225_v52  ;;  %v694_v55 = vpack.c.bf16 %v826_v51, %v305_v53 }
  0xef   :  { %726 = vst [vmem:[#allocation2 + $0x8] sm:$0xff] %v654_v54   ;;  %734 = vst [vmem:[#allocation2 + $0x48] sm:$0xff] %v694_v55   ;;  %v805_v56 = vpop.f32.mrb[4].mxu0  ;;  %v829_v57 = vpop.f32.mrb[4].mxu1 }
  0xf0   :  { %v235_v58 = vpop.f32.mrb[5].mxu0  ;;  %v315_v59 = vpop.f32.mrb[5].mxu1 }
  0xf1   :  { %v659_v60 = vpack.c.bf16 %v805_v56, %v235_v58  ;;  %v699_v61 = vpack.c.bf16 %v829_v57, %v315_v59 }
  0xf3   :  { %727 = vst [vmem:[#allocation2 + $0x10] sm:$0xff] %v659_v60   ;;  %735 = vst [vmem:[#allocation2 + $0x50] sm:$0xff] %v699_v61   ;;  %v808_v62 = vpop.f32.mrb[6].mxu0  ;;  %v832_v63 = vpop.f32.mrb[6].mxu1 }
  0xf4   :  { %v245_v0 = vpop.f32.mrb[7].mxu0  ;;  %v325_v1 = vpop.f32.mrb[7].mxu1 }
  0xf5   :  { %v664_v2 = vpack.c.bf16 %v808_v62, %v245_v0  ;;  %v704_v3 = vpack.c.bf16 %v832_v63, %v325_v1 }
  0xf7   :  { %728 = vst [vmem:[#allocation2 + $0x18] sm:$0xff] %v664_v2   ;;  %736 = vst [vmem:[#allocation2 + $0x58] sm:$0xff] %v704_v3   ;;  %v811_v4 = vpop.f32.mrb[8].mxu0  ;;  %v835_v5 = vpop.f32.mrb[8].mxu1 }
  0xf8   :  { %v255_v6 = vpop.f32.mrb[9].mxu0  ;;  %v335_v7 = vpop.f32.mrb[9].mxu1 }
  0xf9   :  { %v669_v8 = vpack.c.bf16 %v811_v4, %v255_v6  ;;  %v709_v9 = vpack.c.bf16 %v835_v5, %v335_v7 }
  0xfb   :  { %729 = vst [vmem:[#allocation2 + $0x20] sm:$0xff] %v669_v8   ;;  %737 = vst [vmem:[#allocation2 + $0x60] sm:$0xff] %v709_v9   ;;  %v814_v10 = vpop.f32.mrb[10].mxu0  ;;  %v838_v11 = vpop.f32.mrb[10].mxu1 }
  0xfc   :  { %v265_v12 = vpop.f32.mrb[11].mxu0  ;;  %v345_v13 = vpop.f32.mrb[11].mxu1 }
  0xfd   :  { %v674_v14 = vpack.c.bf16 %v814_v10, %v265_v12  ;;  %v714_v15 = vpack.c.bf16 %v838_v11, %v345_v13 }
  0xff   :  { %730 = vst [vmem:[#allocation2 + $0x28] sm:$0xff] %v674_v14   ;;  %738 = vst [vmem:[#allocation2 + $0x68] sm:$0xff] %v714_v15   ;;  %v817_v16 = vpop.f32.mrb[12].mxu0  ;;  %v841_v17 = vpop.f32.mrb[12].mxu1 }
 0x100   :  { %v275_v18 = vpop.f32.mrb[13].mxu0  ;;  %v355_v19 = vpop.f32.mrb[13].mxu1 }
 0x101   :  { %v679_v20 = vpack.c.bf16 %v817_v16, %v275_v18  ;;  %v719_v21 = vpack.c.bf16 %v841_v17, %v355_v19 }
 0x103   :  { %731 = vst [vmem:[#allocation2 + $0x30] sm:$0xff] %v679_v20   ;;  %739 = vst [vmem:[#allocation2 + $0x70] sm:$0xff] %v719_v21   ;;  %v820_v22 = vpop.f32.mrb[14].mxu0  ;;  %v844_v23 = vpop.f32.mrb[14].mxu1 }
 0x104   :  { %v285_v24 = vpop.f32.mrb[15].mxu0  ;;  %v365_v25 = vpop.f32.mrb[15].mxu1 }
 0x105   :  { %v684_v26 = vpack.c.bf16 %v820_v22, %v285_v24  ;;  %v724_v27 = vpack.c.bf16 %v844_v23, %v365_v25 }
 0x107   :  { %732 = vst [vmem:[#allocation2 + $0x38] sm:$0xff] %v684_v26   ;;  %740 = vst [vmem:[#allocation2 + $0x78] sm:$0xff] %v724_v27  }
 0x108   :  { %883 = shalt.err (!%p880_p4)
}
 0x109   :  { %s884_s6 = scalar_lea.hbm %s1080_s2, 2048 }
 0x10a   :  { %p885_p5 = scmp.ne.s32.totalorder %s1080_s2, %s884_s6  ;;  %p888_p6 = scmp.lt.u32.totalorder %s884_s6, %s1080_s2 }
 0x10c   :  { %p890_p7 = pnand %p888_p6, %p885_p5 }
 0x10e   :  { %893 = shalt.err (!%p890_p7)
}
 0x10f   :  { %s897_s11 = smov 64   ;;  %s898_s12 = smov 4  }
 0x110   :  { %545 = dma.vmem_to_hbm [thread:$0]  %s540_s1, 2048, %s1080_s2, [#allocation3], %s897_s11, %s897_s11, %s898_s12  }
 0x111   :  { %894 = dma.done.wait [#allocation3], 2048  }
 0x112   :  { %895 = vsyncadd [#allocation3], 4294965248 }
 0x113   :  { %549 = vsyncpa [#allocation3], 1 }

</bundles_post_ra>
